<compile_context>
chip_gen: v7x
topology: tpu7x:2x2x1
jax: 0.10.0
libtpu: 0.0.40
codegen_flags: <defaults>
</compile_context>

<pallas_src>
from functools import partial

import jax
import jax.numpy as jnp
from jax.experimental import pallas as pl
from jax.experimental.pallas import tpu as pltpu


# ---------------------------------------------------------------------------
# Aliased zero-copy pass-through (only for callers that require a kernel
# boundary AND can donate their input buffers).
# ---------------------------------------------------------------------------
def _identity_alias_kernel(states_hbm_ref, history_hbm_ref,
                           states_out_ref, history_out_ref):
    # Outputs alias inputs (input_output_aliases={0: 0, 1: 1}) and every ref
    # stays in its original memory space (pl.ANY -> no automatic HBM<->VMEM
    # DMA), so the output buffers already hold the input bytes.  Nothing to
    # do: zero bytes moved, zero compute.
    del states_hbm_ref, history_hbm_ref, states_out_ref, history_out_ref


def _identity_alias_call(states, history):
    return pl.pallas_call(
        _identity_alias_kernel,
        out_shape=(
            jax.ShapeDtypeStruct(states.shape, states.dtype),
            jax.ShapeDtypeStruct(history.shape, history.dtype),
        ),
        in_specs=[
            pl.BlockSpec(memory_space=pl.ANY),   # raw HBM ref, no auto-DMA
            pl.BlockSpec(memory_space=pl.ANY),
        ],
        out_specs=(
            pl.BlockSpec(memory_space=pl.ANY),
            pl.BlockSpec(memory_space=pl.ANY),
        ),
        input_output_aliases={0: 0, 1: 1},       # out[0] <- in[0], out[1] <- in[1]
    )(states, history)


# Donation makes the aliasing real: without it XLA inserts a defensive HBM
# copy of both operands before the aliased custom call.  Callers must treat
# the passed-in arrays as consumed (do not reuse them after this call).
identity_encoder_forward_aliased = jax.jit(
    _identity_alias_call, donate_argnums=(0, 1))


# ---------------------------------------------------------------------------
# Materializing copy: direct HBM->HBM DMA (no VMEM staging, no grid).
# ---------------------------------------------------------------------------
def _hbm_copy_kernel(states_hbm_ref, hist_hbm_ref,
                     states_out_ref, hist_out_ref, sems):
    # One DMA descriptor per array, issued back-to-back so both copies are in
    # flight at once, then wait on both.  No VMEM round trip, no vector
    # load/store slots touched, no masked partial stores.
    cp_states = pltpu.make_async_copy(states_hbm_ref, states_out_ref, sems.at[0])
    cp_hist = pltpu.make_async_copy(hist_hbm_ref, hist_out_ref, sems.at[1])
    cp_states.start()
    cp_hist.start()
    cp_states.wait()
    cp_hist.wait()


def identity_encoder_copy(states, history):
    """Identity that produces fresh output buffers via direct HBM->HBM DMA."""
    return pl.pallas_call(
        _hbm_copy_kernel,
        out_shape=(
            jax.ShapeDtypeStruct(states.shape, states.dtype),
            jax.ShapeDtypeStruct(history.shape, history.dtype),
        ),
        in_specs=[
            pl.BlockSpec(memory_space=pl.ANY),
            pl.BlockSpec(memory_space=pl.ANY),
        ],
        out_specs=(
            pl.BlockSpec(memory_space=pl.ANY),
            pl.BlockSpec(memory_space=pl.ANY),
        ),
        scratch_shapes=[pltpu.SemaphoreType.DMA((2,))],
    )(states, history)


# ---------------------------------------------------------------------------
# Module wrapper (mirrors the PyTorch IdentityEncoder / IEncoder API)
# ---------------------------------------------------------------------------
class IdentityEncoder:
    """JAX/Pallas port of the PyTorch IdentityEncoder (IEncoder subclass)."""

    def __init__(self, cfg, size):
        self.n_history = cfg["history_count"]
        self.n_features = cfg["history_features"]
        self.size = size
        # No learnable parameters in this module (identity).

    def out_size(self):
        return self.size

    def count(self):
        return self.n_history

    def total_size(self):
        return self.out_size() * self.count()

    def has_features(self):
        return False

    def forward(self, states, history):
        # Pure pass-through.  The optimal "kernel" for an identity op moves
        # zero bytes and launches zero kernels; use identity_encoder_copy /
        # identity_encoder_forward_aliased only when a distinct materialized
        # buffer or a donated-alias kernel boundary is explicitly required.
        return states, history

    def extract_features(self, states):
        # IEncoder.extract_features builds a zeros history and calls forward.
        # forward is a pure pass-through, so returning the zeros directly is
        # semantically identical and avoids a kernel round trip.
        feats = jnp.zeros((states.shape[0], 1, 1, self.n_features),
                          dtype=states.dtype)
        return states, feats


if __name__ == "__main__":
    key = jax.random.PRNGKey(0)
    k_states, k_history = jax.random.split(key)

    cfg = {"history_count": 4, "history_features": 8}
    size = 32
    batch = 2

    enc = IdentityEncoder(cfg, size)

    # states: [batch, size]; history: [batch, 1, 1, n_features]
    states = jax.random.normal(k_states, (batch, size), dtype=jnp.float32)
    history = jax.random.normal(
        k_history, (batch, 1, 1, cfg["history_features"]), dtype=jnp.float32
    )

    # 1) Primary forward path: true zero-copy pass-through.
    out_states, out_history = enc.forward(states, history)
    assert out_states is states and out_history is history

    # 2) Materializing copy path: single pallas_call, direct HBM->HBM DMA.
    cp_states, cp_history = identity_encoder_copy(states, history)
    jax.block_until_ready((cp_states, cp_history))
    assert cp_states.shape == states.shape and cp_states.dtype == states.dtype
    assert cp_history.shape == history.shape and cp_history.dtype == history.dtype
    assert jnp.array_equal(cp_states, states)
    assert jnp.array_equal(cp_history, history)

    # 3) Aliased + donated kernel-boundary path.  Donation consumes its
    #    arguments, so feed it throwaway copies and never touch them again.
    states_d = jnp.array(states)     # fresh device copies to donate
    history_d = jnp.array(history)
    al_states, al_history = identity_encoder_forward_aliased(states_d, history_d)
    del states_d, history_d          # donated: must not be reused
    jax.block_until_ready((al_states, al_history))
    assert al_states.shape == states.shape and al_states.dtype == states.dtype
    assert al_history.shape == history.shape and al_history.dtype == history.dtype
    assert jnp.array_equal(al_states, states)
    assert jnp.array_equal(al_history, history)

    # 4) extract_features path (zeros history, no kernel round trip).
    fs, fh = enc.extract_features(states)
    jax.block_until_ready((fs, fh))
    assert jnp.array_equal(fs, states)
    assert fh.shape == (batch, 1, 1, cfg["history_features"])
    assert jnp.all(fh == 0.0)

    print("KERNEL_OK")
</pallas_src>

<mosaic_0001>
module attributes {stable_mosaic.version = 11 : i64} {
  func.func @_hbm_copy_kernel(%arg0: memref<2x32xf32, #tpu.memory_space<any>>, %arg1: memref<2x1x1x8xf32, #tpu.memory_space<any>>, %arg2: memref<2x32xf32, #tpu.memory_space<any>>, %arg3: memref<2x1x1x8xf32, #tpu.memory_space<any>>, %arg4: memref<2x!tpu.dma_semaphore, #tpu.memory_space<semaphore_mem>>) attributes {dimension_semantics = [], scalar_prefetch = 0 : i64, scratch_operands = 1 : i64, tpu.core_type = #tpu.core_type<tc>} {
    %c0_i32 = arith.constant 0 : i32
    %0 = tpu.memref_slice %arg4[%c0_i32] : memref<2x!tpu.dma_semaphore, #tpu.memory_space<semaphore_mem>> -> memref<1x!tpu.dma_semaphore, #tpu.memory_space<semaphore_mem>>
    %1 = tpu.memref_squeeze %0 : memref<1x!tpu.dma_semaphore, #tpu.memory_space<semaphore_mem>> -> memref<!tpu.dma_semaphore, #tpu.memory_space<semaphore_mem>>
    tpu.enqueue_dma source(%arg0 : memref<2x32xf32, #tpu.memory_space<any>>) target(%arg2 : memref<2x32xf32, #tpu.memory_space<any>>) target_semaphore(%1 : memref<!tpu.dma_semaphore, #tpu.memory_space<semaphore_mem>>)
    %c1_i32 = arith.constant 1 : i32
    %2 = tpu.memref_slice %arg4[%c1_i32] : memref<2x!tpu.dma_semaphore, #tpu.memory_space<semaphore_mem>> -> memref<1x!tpu.dma_semaphore, #tpu.memory_space<semaphore_mem>>
    %3 = tpu.memref_squeeze %2 : memref<1x!tpu.dma_semaphore, #tpu.memory_space<semaphore_mem>> -> memref<!tpu.dma_semaphore, #tpu.memory_space<semaphore_mem>>
    tpu.enqueue_dma source(%arg1 : memref<2x1x1x8xf32, #tpu.memory_space<any>>) target(%arg3 : memref<2x1x1x8xf32, #tpu.memory_space<any>>) target_semaphore(%3 : memref<!tpu.dma_semaphore, #tpu.memory_space<semaphore_mem>>)
    %c0_i32_0 = arith.constant 0 : i32
    %4 = tpu.memref_slice %arg4[%c0_i32_0] : memref<2x!tpu.dma_semaphore, #tpu.memory_space<semaphore_mem>> -> memref<1x!tpu.dma_semaphore, #tpu.memory_space<semaphore_mem>>
    %5 = tpu.memref_squeeze %4 : memref<1x!tpu.dma_semaphore, #tpu.memory_space<semaphore_mem>> -> memref<!tpu.dma_semaphore, #tpu.memory_space<semaphore_mem>>
    tpu.wait_dma2 semaphore(%5 : memref<!tpu.dma_semaphore, #tpu.memory_space<semaphore_mem>>) src(%arg0 : memref<2x32xf32, #tpu.memory_space<any>>) dst(%arg2 : memref<2x32xf32, #tpu.memory_space<any>>)
    %c1_i32_1 = arith.constant 1 : i32
    %6 = tpu.memref_slice %arg4[%c1_i32_1] : memref<2x!tpu.dma_semaphore, #tpu.memory_space<semaphore_mem>> -> memref<1x!tpu.dma_semaphore, #tpu.memory_space<semaphore_mem>>
    %7 = tpu.memref_squeeze %6 : memref<1x!tpu.dma_semaphore, #tpu.memory_space<semaphore_mem>> -> memref<!tpu.dma_semaphore, #tpu.memory_space<semaphore_mem>>
    tpu.wait_dma2 semaphore(%7 : memref<!tpu.dma_semaphore, #tpu.memory_space<semaphore_mem>>) src(%arg1 : memref<2x1x1x8xf32, #tpu.memory_space<any>>) dst(%arg3 : memref<2x1x1x8xf32, #tpu.memory_space<any>>)
    return
  }
}

</mosaic_0001>

<bundles_post_ra>
// kernel: tpu_custom_call.1
= control target key start
LH: loop header
LB: loop body
LE: loop exit
PB: predicated region body
PF: predicated region fallthrough
CT: control target
= control target key end

     0   :  { %s85_s15 = smov [#allocation2]   ;;  %s86_s16 = smov [#allocation3]   ;;  %s129_s0 = inlined_call_operand.hbm [shape: f32[2,32], index: 0, kind: input, shape index: {}]   ;;  %s130_s2 = inlined_call_operand.hbm [shape: f32[2,32], index: 2, kind: output, shape index: {0}]   ;;  %s131_s1 = inlined_call_operand.vmem [shape: f32[2,1,1,8], index: 1, kind: input, shape index: {}]   ;;  %s132_s3 = inlined_call_operand.hbm [shape: f32[2,1,1,8], index: 3, kind: output, shape index: {1}]  }
   0x1   :  { %s30_s14 = sshll.u32 %s131_s1, 4  ;;  %s87_s17 = smov 0   ;;  %s31_s14 = int_to_ptr.vmem [resolvable:$true] %s30_s14 }
   0x2   :  { %21 = dma.general %s129_s0, 32, %s130_s2, %s85_s15, %s86_s16, [#allocation4], %s87_s17, 0  }
   0x3   :  { %s59_s22 = scalar_lea.vmem %s31_s14, 32  ;;  %p64_p1 = scmp.lt.s32.totalorder %s31_s14, %s31_s14 }
   0x4   :  { %p60_p0 = scmp.ne.s32.totalorder %s31_s14, %s59_s22  ;;  %p65_p2 = scmp.lt.s32.totalorder %s59_s22, %s59_s22 }
   0x6   :  { %p66_p3 = por %p65_p2, %p64_p1 }
   0x8   :  { %p67_p4 = pnand %p66_p3, %p60_p0 }
   0xa   :  { %70 = shalt.err (!%p67_p4)  }
   0xb   :  { %s71_s24 = scalar_lea.hbm %s132_s3, 32 }
   0xc   :  { %p72_p5 = scmp.ne.s32.totalorder %s132_s3, %s71_s24  ;;  %p75_p6 = scmp.lt.u32.totalorder %s71_s24, %s132_s3 }
   0xe   :  { %p77_p7 = pnand %p75_p6, %p72_p5 }
  0x10   :  { %80 = shalt.err (!%p77_p7)  }
  0x11   :  { %33 = dma.vmem_to_hbm [thread:$0]  %s31_s14, 32, %s132_s3, [#allocation2 + $0x1] }
  0x12   :  { %81 = dma.done.wait [#allocation2], 32 }
  0x13   :  { %82 = vsyncadd [#allocation2], 4294967264 }
  0x14   :  { %83 = dma.done.wait [#allocation2 + $0x1], 32 }
  0x15   :  { %84 = vsyncadd [#allocation2 + $0x1], 4294967264 }
  0x16   :  { %41 = vsyncmov [#allocation2] }
  0x19   :  { %s42_s29 = vpop.sfrf %41 }
  0x1a   :  { %p54_p8 = scmp.ne.s32.totalorder %s42_s29, 0 }
  0x1c   :  { %46 = shalt.err (%p54_p8)  }
  0x1d   :  { %48 = vsyncmov [#allocation2 + $0x1] }
  0x20   :  { %s49_s30 = vpop.sfrf %48 }
  0x21   :  { %p55_p9 = scmp.ne.s32.totalorder %s49_s30, 0 }
  0x23   :  { %53 = shalt.err (%p55_p9)  }

</bundles_post_ra>
